<compile_context>
chip_gen: v5e
topology: v5e:2x2
jax: 0.10.0
libtpu: 0.0.40
codegen_flags: <defaults>
</compile_context>

<pallas_src>
import functools

import jax
import jax.numpy as jnp
from jax import lax
from jax.experimental import pallas as pl
from jax.experimental.pallas import tpu as pltpu

BN_EPS = 1e-5
_NEG = jnp.finfo(jnp.float32).min


def _round_up(x, m):
    return ((x + m - 1) // m) * m


def _global_sa_kernel(num_batches, tiles_per_slice,
                      lo_ref, hi_ref,                      # scalar prefetch (SMEM)
                      xpos_ref, w1_ref, b1_ref, w2_ref, aff2_ref,
                      out_ref, tile_max_ref):
    """One grid step: fused MLP over a tile of points + fold its per-batch max
    into the resident [B_pad, C_pad] accumulator.

    xpos_ref: [TILE_N, D0+1] bf16, last column = batch id (-1 for padding rows)
    w1_ref:   [D0+1, D1] bf16 (extra zero row so the id column is inert)
    b1_ref:   [1, D1] f32
    w2_ref:   [D1, C_pad] bf16 (BN1 folded in)
    aff2_ref: [3, C_pad] f32 = (b2_folded, bn2_scale, bn2_shift)
    out_ref:  [B_pad, C_pad] f32 running per-batch max (resident over axis 1)
    tile_max_ref: [B_pad, C_pad] f32 VMEM scratch for this tile's row maxes
    """
    i = pl.program_id(1)

    @pl.when(i == 0)
    def _init():
        out_ref[...] = jnp.full_like(out_ref, _NEG)
        tile_max_ref[...] = jnp.full_like(tile_max_ref, _NEG)

    # ---- fused MLP: Lin1 -> ReLU (BN1 folded into W2/b2) -> Lin2 -> ReLU -> BN2 FMA ----
    xp = xpos_ref[...]                                                    # bf16
    h = jnp.dot(xp, w1_ref[...], preferred_element_type=jnp.float32) + b1_ref[...]
    h = jnp.maximum(h, 0.0)
    z = jnp.dot(h.astype(jnp.bfloat16), w2_ref[...],
                preferred_element_type=jnp.float32)
    z = jnp.maximum(z + aff2_ref[0:1, :], 0.0)
    z = z * aff2_ref[1:2, :] + aff2_ref[2:3, :]          # BatchNorm2 (running stats)

    # ---- per-batch max over this tile, gated to the batches actually present ----
    bid_col = xp[:, xp.shape[1] - 1:].astype(jnp.float32)   # [TILE_N, 1]; -1 = pad
    t = pl.program_id(0) * tiles_per_slice + i
    lo = lo_ref[t]
    hi = hi_ref[t]
    for b in range(num_batches):                          # static; B is small
        @pl.when(jnp.logical_and(lo <= b, b <= hi))
        def _pool(b=b):
            member = bid_col == jnp.float32(b)            # [TILE_N, 1]
            tile_max_ref[b, :] = jnp.max(jnp.where(member, z, _NEG), axis=0)

    # One dense lane-aligned [B_pad, C_pad] store per step.  Stale scratch rows
    # (batches not in this tile) were already folded into the running max.
    out_ref[...] = jnp.maximum(out_ref[...], tile_max_ref[...])


def global_sa_module(x, pos, batch, params, num_batches,
                     tile_n=8192, num_slices=2):
    """JAX wrapper reproducing GlobalSAModule.forward (inference BN stats).

    x:     [N, Cx] float32 point features
    pos:   [N, 3]  float32 point coordinates
    batch: [N]     int32 batch index per point
    Returns (x_out [B, C_out], pos_out [B, 3], batch_out [B]).
    """
    (w1, b1, g1, bt1, m1, v1, w2, b2, g2, bt2, m2, v2) = params

    # --- fold BN1 into layer-2 weights/bias; express BN2 as one FMA (scale, shift) ---
    s1 = g1 * lax.rsqrt(v1 + BN_EPS)          # [1, D1]
    t1 = bt1 - m1 * s1                        # [1, D1]
    w2f = s1.reshape(-1, 1) * w2              # [D1, D2]
    b2f = t1 @ w2 + b2                        # [1, D2]
    s2 = g2 * lax.rsqrt(v2 + BN_EPS)          # [1, D2]
    t2 = bt2 - m2 * s2                        # [1, D2]

    # --- pad output channels to a lane-dense multiple of 128 (zero columns are inert) ---
    c_out = w2.shape[1]
    c_pad = _round_up(c_out, 128)
    if c_pad != c_out:
        pc = c_pad - c_out
        w2f = jnp.pad(w2f, ((0, 0), (0, pc)))
        b2f = jnp.pad(b2f, ((0, 0), (0, pc)))
        s2 = jnp.pad(s2, ((0, 0), (0, pc)))
        t2 = jnp.pad(t2, ((0, 0), (0, pc)))
    aff2 = jnp.concatenate([b2f, s2, t2], axis=0).astype(jnp.float32)   # [3, C_pad]

    # --- pack the batch id as an extra (zero-weighted) input column of xpos ---
    n = x.shape[0]
    d0 = x.shape[1] + pos.shape[1]
    d0p = d0 + 1
    bidcol = batch.astype(jnp.float32).reshape(-1, 1)      # exact in bf16 for ids < 256
    xpos = jnp.concatenate(
        [x.astype(jnp.float32), pos.astype(jnp.float32), bidcol], axis=1)
    w1p = jnp.concatenate([w1, jnp.zeros((1, w1.shape[1]), w1.dtype)], axis=0)
    d1 = w1p.shape[1]

    # --- tile the point axis; pad N so the grid divides evenly (pad rows get id -1) ---
    num_slices = max(1, int(num_slices))
    tile_n = _round_up(max(16, min(tile_n, _round_up(n, 16))), 16)
    n_pad = _round_up(n, tile_n * num_slices)
    if n_pad != n:
        pad = jnp.zeros((n_pad - n, d0p), jnp.float32).at[:, -1].set(-1.0)
        xpos = jnp.concatenate([xpos, pad], axis=0)
    xpos = xpos.astype(jnp.bfloat16)                       # halves HBM->VMEM bytes
    w1p = w1p.astype(jnp.bfloat16)
    w2f = w2f.astype(jnp.bfloat16)
    b1 = b1.astype(jnp.float32)

    # --- per-tile batch-id range for gating the pooling loop (sorted or not) ---
    n_tiles = n_pad // tile_n
    tiles_per_slice = n_tiles // num_slices
    bid_i32 = batch.astype(jnp.int32)
    big = jnp.iinfo(jnp.int32).max // 2
    lo = jnp.pad(bid_i32, (0, n_pad - n), constant_values=big) \
            .reshape(n_tiles, tile_n).min(axis=1)
    hi = jnp.pad(bid_i32, (0, n_pad - n), constant_values=-1) \
            .reshape(n_tiles, tile_n).max(axis=1)

    b_pad = _round_up(max(num_batches, 8), 8)              # dense-sublane accumulator

    flops = 2 * n_pad * (d0p * d1 + d1 * c_pad)
    bytes_accessed = (n_pad * d0p * 2                       # bf16 points
                      + (w1p.size + w2f.size) * 2 + (b1.size + aff2.size) * 4
                      + num_slices * b_pad * c_pad * 4 + 2 * n_tiles * 4)

    res = lambda c, i, lo, hi: (0, 0)                       # VMEM-resident operands
    grid_spec = pltpu.PrefetchScalarGridSpec(
        num_scalar_prefetch=2,
        grid=(num_slices, tiles_per_slice),
        in_specs=[
            pl.BlockSpec((tile_n, d0p),
                         lambda c, i, lo, hi: (c * tiles_per_slice + i, 0)),
            pl.BlockSpec(w1p.shape, res),
            pl.BlockSpec(b1.shape, res),
            pl.BlockSpec(w2f.shape, res),
            pl.BlockSpec(aff2.shape, res),
        ],
        out_specs=pl.BlockSpec((None, b_pad, c_pad),
                               lambda c, i, lo, hi: (c, 0, 0)),
        scratch_shapes=[pltpu.VMEM((b_pad, c_pad), jnp.float32)],
    )

    out = pl.pallas_call(
        functools.partial(_global_sa_kernel, num_batches, tiles_per_slice),
        out_shape=jax.ShapeDtypeStruct((num_slices, b_pad, c_pad), jnp.float32),
        grid_spec=grid_spec,
        compiler_params=pltpu.CompilerParams(
            dimension_semantics=("parallel", "arbitrary")),
        cost_estimate=pl.CostEstimate(
            flops=flops, transcendentals=0, bytes_accessed=bytes_accessed),
    )(lo, hi, xpos, w1p, b1, w2f, aff2)

    x_out = jnp.max(out, axis=0)[:num_batches, :c_out]      # combine per-core slabs
    pos_out = jnp.zeros((num_batches, 3), dtype=pos.dtype)   # glue (torch: new_zeros)
    batch_out = jnp.arange(num_batches, dtype=jnp.int32)     # glue (torch: arange)
    return x_out, pos_out, batch_out


def _make_params(key, channels):
    """Deterministic init for MLP([c0, c1, c2]) = Seq(Lin, ReLU, BN) per layer."""
    params = []
    for i in range(1, len(channels)):
        din, dout = channels[i - 1], channels[i]
        key, kw, kb, km, kv = jax.random.split(key, 5)
        w = jax.random.normal(kw, (din, dout), jnp.float32) * 0.1   # torch Lin.weight.T
        b = jax.random.normal(kb, (1, dout), jnp.float32) * 0.05
        gamma = jnp.ones((1, dout), jnp.float32)
        beta = jnp.zeros((1, dout), jnp.float32)
        mean = jax.random.normal(km, (1, dout), jnp.float32) * 0.02
        var = jnp.abs(jax.random.normal(kv, (1, dout), jnp.float32)) * 0.1 + 1.0
        params += [w, b, gamma, beta, mean, var]
    return tuple(params)


def _reference(x, pos, batch, params, num_batches):
    """Pure-JAX reference mirroring the PyTorch module (running BN stats)."""
    (w1, b1, g1, bt1, m1, v1, w2, b2, g2, bt2, m2, v2) = params
    h = jnp.concatenate([x, pos], axis=1)
    h = jnp.maximum(h @ w1 + b1, 0.0)
    h = (h - m1) / jnp.sqrt(v1 + BN_EPS) * g1 + bt1
    h = jnp.maximum(h @ w2 + b2, 0.0)
    h = (h - m2) / jnp.sqrt(v2 + BN_EPS) * g2 + bt2
    neg = jnp.finfo(jnp.float32).min
    outs = []
    for b in range(num_batches):
        m = (batch == b)[:, None]
        outs.append(jnp.max(jnp.where(m, h, neg), axis=0))
    return jnp.stack(outs, axis=0)


if __name__ == "__main__":
    key = jax.random.PRNGKey(0)

    # bf16 MXU inputs (f32 accumulation) -> compare at bf16-appropriate tolerance.
    RTOL = ATOL = 2e-2

    # --- test 1: small shapes (2 batches x 8 points, MLP [7, 32, 64]) ---
    N, B, CX = 16, 2, 4
    channels = [CX + 3, 32, 64]

    key, kx, kp = jax.random.split(key, 3)
    x = jax.random.normal(kx, (N, CX), jnp.float32)
    pos = jax.random.normal(kp, (N, 3), jnp.float32)
    batch = jnp.concatenate([jnp.zeros(8, jnp.int32), jnp.ones(8, jnp.int32)])
    params = _make_params(key, channels)

    x_out, pos_out, batch_out = global_sa_module(x, pos, batch, params, B)
    jax.block_until_ready((x_out, pos_out, batch_out))

    ref = _reference(x, pos, batch, params, B)
    assert x_out.shape == (B, channels[-1])
    assert pos_out.shape == (B, 3)
    assert batch_out.shape == (B,)
    assert jnp.allclose(x_out, ref, rtol=RTOL, atol=ATOL)

    # --- test 2: exercises the multi-tile grid + N padding + gating path ---
    N2, B2 = 1000, 3
    key, kx2, kp2 = jax.random.split(key, 3)
    x2 = jax.random.normal(kx2, (N2, CX), jnp.float32)
    pos2 = jax.random.normal(kp2, (N2, 3), jnp.float32)
    batch2 = jnp.minimum(jnp.arange(N2, dtype=jnp.int32) // (N2 // B2), B2 - 1)

    x_out2, _, _ = global_sa_module(x2, pos2, batch2, params, B2, tile_n=256)
    jax.block_until_ready(x_out2)
    ref2 = _reference(x2, pos2, batch2, params, B2)
    assert jnp.allclose(x_out2, ref2, rtol=RTOL, atol=ATOL)

    print("KERNEL_OK")
</pallas_src>

<mosaic_0001>
module attributes {stable_mosaic.version = 11 : i64} {
  func.func @_global_sa_kernel(%arg0: i32, %arg1: i32, %arg2: memref<2xi32, #tpu.memory_space<smem>>, %arg3: memref<2xi32, #tpu.memory_space<smem>>, %arg4: memref<16x8xbf16, #tpu.memory_space<vmem>>, %arg5: memref<8x32xbf16, #tpu.memory_space<vmem>>, %arg6: memref<1x32xf32, #tpu.memory_space<vmem>>, %arg7: memref<32x128xbf16, #tpu.memory_space<vmem>>, %arg8: memref<3x128xf32, #tpu.memory_space<vmem>>, %arg9: memref<1x8x128xf32, #tpu.memory_space<vmem>>, %arg10: memref<8x128xf32, #tpu.memory_space<vmem>>) attributes {dimension_semantics = [#tpu.dimension_semantics<parallel>, #tpu.dimension_semantics<arbitrary>], iteration_bounds = array<i64: 2, 1>, scalar_prefetch = 2 : i64, scratch_operands = 1 : i64, tpu.core_type = #tpu.core_type<tc>, window_params = [{transform_indices = @transform_0, window_bounds = array<i64: 16, 8>}, {pipeline_mode = #tpu.pipeline_mode<synchronous>, transform_indices = @transform_1, window_bounds = array<i64: 8, 32>}, {pipeline_mode = #tpu.pipeline_mode<synchronous>, transform_indices = @transform_2, window_bounds = array<i64: 1, 32>}, {pipeline_mode = #tpu.pipeline_mode<synchronous>, transform_indices = @transform_3, window_bounds = array<i64: 32, 128>}, {pipeline_mode = #tpu.pipeline_mode<synchronous>, transform_indices = @transform_4, window_bounds = array<i64: 3, 128>}, {transform_indices = @transform_5, window_bounds = array<i64: 1, 8, 128>}]} {
    %c0_i32 = arith.constant 0 : i32
    %0 = arith.cmpi eq, %arg1, %c0_i32 : i32
    %1 = arith.extui %0 : i1 to i32
    %c0_i32_0 = arith.constant 0 : i32
    %2 = arith.cmpi ne, %1, %c0_i32_0 : i32
    scf.if %2 {
      %cst_29 = arith.constant -3.40282347E+38 : f32
      %50 = vector.broadcast %cst_29 : f32 to vector<8x128xf32>
      %c0_30 = arith.constant 0 : index
      %c0_31 = arith.constant 0 : index
      %c0_32 = arith.constant 0 : index
      %51 = vector.load %arg9[%c0_30, %c0_31, %c0_32] : memref<1x8x128xf32, #tpu.memory_space<vmem>>, vector<1x8x128xf32>
      %52 = vector.shape_cast %51 : vector<1x8x128xf32> to vector<8x128xf32>
      %53 = vector.shape_cast %50 : vector<8x128xf32> to vector<1x8x128xf32>
      tpu.vector_store %arg9[%c0_30, %c0_31, %c0_32], %53 {strides = array<i32>} : memref<1x8x128xf32, #tpu.memory_space<vmem>>, vector<1x8x128xf32>,
      %cst_33 = arith.constant -3.40282347E+38 : f32
      %54 = vector.broadcast %cst_33 : f32 to vector<8x128xf32>
      %c0_34 = arith.constant 0 : index
      %c0_35 = arith.constant 0 : index
      %55 = vector.load %arg10[%c0_34, %c0_35] : memref<8x128xf32, #tpu.memory_space<vmem>>, vector<8x128xf32>
      tpu.vector_store %arg10[%c0_34, %c0_35], %54 {strides = array<i32>} : memref<8x128xf32, #tpu.memory_space<vmem>>, vector<8x128xf32>,
    } else {
    }
    %c0 = arith.constant 0 : index
    %c0_1 = arith.constant 0 : index
    %3 = vector.load %arg4[%c0, %c0_1] : memref<16x8xbf16, #tpu.memory_space<vmem>>, vector<16x8xbf16>
    %c0_2 = arith.constant 0 : index
    %c0_3 = arith.constant 0 : index
    %4 = vector.load %arg5[%c0_2, %c0_3] : memref<8x32xbf16, #tpu.memory_space<vmem>>, vector<8x32xbf16>
    %cst = arith.constant dense<0.000000e+00> : vector<16x32xf32>
    %5 = tpu.matmul %3, %4, %cst {dimension_numbers = #tpu.dot_dimension_numbers<[1], [0], [0], [1], [0, 0, 1, 1], [], []>} : vector<16x8xbf16>, vector<8x32xbf16>, vector<16x32xf32> -> vector<16x32xf32>
    %c0_4 = arith.constant 0 : index
    %c0_5 = arith.constant 0 : index
    %6 = vector.load %arg6[%c0_4, %c0_5] : memref<1x32xf32, #tpu.memory_space<vmem>>, vector<1x32xf32>
    %7 = vector.broadcast %6 : vector<1x32xf32> to vector<16x32xf32>
    %8 = arith.addf %5, %7 : vector<16x32xf32>
    %cst_6 = arith.constant 0.000000e+00 : f32
    %9 = vector.broadcast %cst_6 : f32 to vector<16x32xf32>
    %10 = arith.maximumf %8, %9 : vector<16x32xf32>
    %11 = arith.truncf %10 : vector<16x32xf32> to vector<16x32xbf16>
    %c0_7 = arith.constant 0 : index
    %c0_8 = arith.constant 0 : index
    %12 = vector.load %arg7[%c0_7, %c0_8] : memref<32x128xbf16, #tpu.memory_space<vmem>>, vector<32x128xbf16>
    %cst_9 = arith.constant dense<0.000000e+00> : vector<16x128xf32>
    %13 = tpu.matmul %11, %12, %cst_9 {dimension_numbers = #tpu.dot_dimension_numbers<[1], [0], [0], [1], [0, 0, 1, 1], [], []>} : vector<16x32xbf16>, vector<32x128xbf16>, vector<16x128xf32> -> vector<16x128xf32>
    %c0_10 = arith.constant 0 : index
    %c0_11 = arith.constant 0 : index
    %14 = vector.load %arg8[%c0_10, %c0_11] : memref<3x128xf32, #tpu.memory_space<vmem>>, vector<1x128xf32>
    %15 = vector.broadcast %14 : vector<1x128xf32> to vector<16x128xf32>
    %16 = arith.addf %13, %15 : vector<16x128xf32>
    %cst_12 = arith.constant 0.000000e+00 : f32
    %17 = vector.broadcast %cst_12 : f32 to vector<16x128xf32>
    %18 = arith.maximumf %16, %17 : vector<16x128xf32>
    %c1 = arith.constant 1 : index
    %c0_13 = arith.constant 0 : index
    %19 = vector.load %arg8[%c1, %c0_13] : memref<3x128xf32, #tpu.memory_space<vmem>>, vector<1x128xf32>
    %20 = vector.broadcast %19 : vector<1x128xf32> to vector<16x128xf32>
    %21 = arith.mulf %18, %20 : vector<16x128xf32>
    %c2 = arith.constant 2 : index
    %c0_14 = arith.constant 0 : index
    %22 = vector.load %arg8[%c2, %c0_14] : memref<3x128xf32, #tpu.memory_space<vmem>>, vector<1x128xf32>
    %23 = vector.broadcast %22 : vector<1x128xf32> to vector<16x128xf32>
    %24 = arith.addf %21, %23 : vector<16x128xf32>
    %25 = vector.extract_strided_slice %3 {offsets = [0, 7], sizes = [16, 1], strides = [1, 1]} : vector<16x8xbf16> to vector<16x1xbf16>
    %26 = arith.extf %25 : vector<16x1xbf16> to vector<16x1xf32>
    %c1_i32 = arith.constant 1 : i32
    %27 = arith.muli %arg0, %c1_i32 : i32
    %28 = arith.addi %27, %arg1 : i32
    %29 = arith.index_cast %28 : i32 to index
    %30 = memref.load %arg2[%29] : memref<2xi32, #tpu.memory_space<smem>>
    %31 = arith.index_cast %28 : i32 to index
    %32 = memref.load %arg3[%31] : memref<2xi32, #tpu.memory_space<smem>>
    %c0_i32_15 = arith.constant 0 : i32
    %33 = arith.cmpi sle, %30, %c0_i32_15 : i32
    %c0_i32_16 = arith.constant 0 : i32
    %34 = arith.cmpi sge, %32, %c0_i32_16 : i32
    %35 = arith.andi %33, %34 : i1
    %36 = arith.extui %35 : i1 to i32
    %c0_i32_17 = arith.constant 0 : i32
    %37 = arith.cmpi ne, %36, %c0_i32_17 : i32
    scf.if %37 {
      %cst_29 = arith.constant 0.000000e+00 : f32
      %50 = vector.broadcast %cst_29 : f32 to vector<16x1xf32>
      %51 = arith.cmpf oeq, %26, %50 : vector<16x1xf32>
      %cst_30 = arith.constant -3.40282347E+38 : f32
      %52 = vector.shape_cast %51 : vector<16x1xi1> to vector<16x1xi1>
      %53 = vector.broadcast %52 : vector<16x1xi1> to vector<16x128xi1>
      %54 = vector.broadcast %cst_30 : f32 to vector<16x128xf32>
      %55 = arith.select %53, %24, %54 : vector<16x128xi1>, vector<16x128xf32>
      %cst_31 = arith.constant dense<0xFF800000> : vector<128xf32>
      %56 = vector.multi_reduction <maximumf>, %55, %cst_31 [0] : vector<16x128xf32> to vector<128xf32>
      %c0_32 = arith.constant 0 : index
      %c0_33 = arith.constant 0 : index
      %57 = vector.load %arg10[%c0_32, %c0_33] : memref<8x128xf32, #tpu.memory_space<vmem>>, vector<1x128xf32>
      %58 = vector.shape_cast %57 : vector<1x128xf32> to vector<128xf32>
      %59 = vector.shape_cast %56 : vector<128xf32> to vector<1x128xf32>
      tpu.vector_store %arg10[%c0_32, %c0_33], %59 {strides = array<i32>} : memref<8x128xf32, #tpu.memory_space<vmem>>, vector<1x128xf32>,
    } else {
    }
    %c1_i32_18 = arith.constant 1 : i32
    %38 = arith.cmpi sle, %30, %c1_i32_18 : i32
    %c1_i32_19 = arith.constant 1 : i32
    %39 = arith.cmpi sge, %32, %c1_i32_19 : i32
    %40 = arith.andi %38, %39 : i1
    %41 = arith.extui %40 : i1 to i32
    %c0_i32_20 = arith.constant 0 : i32
    %42 = arith.cmpi ne, %41, %c0_i32_20 : i32
    scf.if %42 {
      %cst_29 = arith.constant 1.000000e+00 : f32
      %50 = vector.broadcast %cst_29 : f32 to vector<16x1xf32>
      %51 = arith.cmpf oeq, %26, %50 : vector<16x1xf32>
      %cst_30 = arith.constant -3.40282347E+38 : f32
      %52 = vector.shape_cast %51 : vector<16x1xi1> to vector<16x1xi1>
      %53 = vector.broadcast %52 : vector<16x1xi1> to vector<16x128xi1>
      %54 = vector.broadcast %cst_30 : f32 to vector<16x128xf32>
      %55 = arith.select %53, %24, %54 : vector<16x128xi1>, vector<16x128xf32>
      %cst_31 = arith.constant dense<0xFF800000> : vector<128xf32>
      %56 = vector.multi_reduction <maximumf>, %55, %cst_31 [0] : vector<16x128xf32> to vector<128xf32>
      %c1_32 = arith.constant 1 : index
      %c0_33 = arith.constant 0 : index
      %57 = vector.load %arg10[%c1_32, %c0_33] : memref<8x128xf32, #tpu.memory_space<vmem>>, vector<1x128xf32>
      %58 = vector.shape_cast %57 : vector<1x128xf32> to vector<128xf32>
      %59 = vector.shape_cast %56 : vector<128xf32> to vector<1x128xf32>
      tpu.vector_store %arg10[%c1_32, %c0_33], %59 {strides = array<i32>} : memref<8x128xf32, #tpu.memory_space<vmem>>, vector<1x128xf32>,
    } else {
    }
    %c0_21 = arith.constant 0 : index
    %c0_22 = arith.constant 0 : index
    %c0_23 = arith.constant 0 : index
    %43 = vector.load %arg9[%c0_21, %c0_22, %c0_23] : memref<1x8x128xf32, #tpu.memory_space<vmem>>, vector<1x8x128xf32>
    %44 = vector.shape_cast %43 : vector<1x8x128xf32> to vector<8x128xf32>
    %c0_24 = arith.constant 0 : index
    %c0_25 = arith.constant 0 : index
    %45 = vector.load %arg10[%c0_24, %c0_25] : memref<8x128xf32, #tpu.memory_space<vmem>>, vector<8x128xf32>
    %46 = arith.maximumf %44, %45 : vector<8x128xf32>
    %c0_26 = arith.constant 0 : index
    %c0_27 = arith.constant 0 : index
    %c0_28 = arith.constant 0 : index
    %47 = vector.load %arg9[%c0_26, %c0_27, %c0_28] : memref<1x8x128xf32, #tpu.memory_space<vmem>>, vector<1x8x128xf32>
    %48 = vector.shape_cast %47 : vector<1x8x128xf32> to vector<8x128xf32>
    %49 = vector.shape_cast %46 : vector<8x128xf32> to vector<1x8x128xf32>
    tpu.vector_store %arg9[%c0_26, %c0_27, %c0_28], %49 {strides = array<i32>} : memref<1x8x128xf32, #tpu.memory_space<vmem>>, vector<1x8x128xf32>,
    return
  }
  func.func @transform_0(%arg0: i32, %arg1: i32, %arg2: memref<2xi32, #tpu.memory_space<smem>>, %arg3: memref<2xi32, #tpu.memory_space<smem>>) -> (i32, i32) {
    %c1_i32 = arith.constant 1 : i32
    %0 = arith.muli %arg0, %c1_i32 : i32
    %1 = arith.addi %0, %arg1 : i32
    %c0_i32 = arith.constant 0 : i32
    %c0_i32_0 = arith.constant 0 : i32
    return %1, %c0_i32 : i32, i32
  }
  func.func @transform_1(%arg0: i32, %arg1: i32, %arg2: memref<2xi32, #tpu.memory_space<smem>>, %arg3: memref<2xi32, #tpu.memory_space<smem>>) -> (i32, i32) {
    %c0_i32 = arith.constant 0 : i32
    %c0_i32_0 = arith.constant 0 : i32
    %c0_i32_1 = arith.constant 0 : i32
    return %c0_i32, %c0_i32_0 : i32, i32
  }
  func.func @transform_2(%arg0: i32, %arg1: i32, %arg2: memref<2xi32, #tpu.memory_space<smem>>, %arg3: memref<2xi32, #tpu.memory_space<smem>>) -> (i32, i32) {
    %c0_i32 = arith.constant 0 : i32
    %c0_i32_0 = arith.constant 0 : i32
    %c0_i32_1 = arith.constant 0 : i32
    return %c0_i32, %c0_i32_0 : i32, i32
  }
  func.func @transform_3(%arg0: i32, %arg1: i32, %arg2: memref<2xi32, #tpu.memory_space<smem>>, %arg3: memref<2xi32, #tpu.memory_space<smem>>) -> (i32, i32) {
    %c0_i32 = arith.constant 0 : i32
    %c0_i32_0 = arith.constant 0 : i32
    %c0_i32_1 = arith.constant 0 : i32
    return %c0_i32, %c0_i32_0 : i32, i32
  }
  func.func @transform_4(%arg0: i32, %arg1: i32, %arg2: memref<2xi32, #tpu.memory_space<smem>>, %arg3: memref<2xi32, #tpu.memory_space<smem>>) -> (i32, i32) {
    %c0_i32 = arith.constant 0 : i32
    %c0_i32_0 = arith.constant 0 : i32
    %c0_i32_1 = arith.constant 0 : i32
    return %c0_i32, %c0_i32_0 : i32, i32
  }
  func.func @transform_5(%arg0: i32, %arg1: i32, %arg2: memref<2xi32, #tpu.memory_space<smem>>, %arg3: memref<2xi32, #tpu.memory_space<smem>>) -> (i32, i32, i32) {
    %c0_i32 = arith.constant 0 : i32
    %c0_i32_0 = arith.constant 0 : i32
    %c0_i32_1 = arith.constant 0 : i32
    return %arg0, %c0_i32, %c0_i32_0 : i32, i32, i32
  }
}

</mosaic_0001>

<bundles_post_ra>
// kernel: tpu_custom_call.1
= control target key start
LH: loop header
LB: loop body
LE: loop exit
PB: predicated region body
PF: predicated region fallthrough
CT: control target
= control target key end

     0   :  { %s774_s30 = smov [#allocation4]   ;;  %s775_s8 = smov [#allocation5]   ;;  %s979_s0 = inlined_call_operand.hbm [shape: s32[2], index: 0, kind: input, shape index: {}]   ;;  %s980_s2 = inlined_call_operand.vmem [shape: bf16[32,8], index: 2, kind: input, shape index: {}]   ;;  %s981_s3 = inlined_call_operand.vmem [shape: bf16[8,32], index: 3, kind: input, shape index: {}]   ;;  %s982_s4 = inlined_call_operand.hbm [shape: f32[1,32], index: 4, kind: input, shape index: {}]   ;;  %s983_s5 = inlined_call_operand.vmem [shape: bf16[32,128], index: 5, kind: input, shape index: {}]   ;;  %s984_s6 = inlined_call_operand.vmem [shape: f32[3,128], index: 6, kind: input, shape index: {}]   ;;  %s985_s7 = inlined_call_operand.hbm [shape: f32[2,8,128], index: 7, kind: output, shape index: {}]   ;;  %s986_s1 = inlined_call_operand.hbm [shape: s32[2], index: 1, kind: input, shape index: {}]  }
   0x1   :  { %s13_s26 = sshll.u32 %s979_s0, 4  ;;  %s18_s29 = sshll.u32 %s986_s1, 4  ;;  %s14_s26 = int_to_ptr.hbm [resolvable:$true] %s13_s26  ;;  %s19_s29 = int_to_ptr.hbm [resolvable:$true] %s18_s29 }
   0x2   :  { %16 = dma.hbm_to_smem %s14_s26, 16, %s774_s30, [#allocation3] }
   0x3   :  { %21 = dma.hbm_to_smem %s19_s29, 16, %s775_s8, [#allocation3] }
   0x4   :  { %740 = dma.done.wait [#allocation3], 32 }
   0x5   :  { %741 = vsyncadd [#allocation3], 4294967264 }
   0x6   :  { %24 = sfence }
   0x7   :  { %25 = vsyncpa [#allocation7], 0 }
   0x8   :  { %26 = vsyncpa [#allocation8], 0 }
   0x9   :  { %28 = vsyncpa [#allocation8 + $0x1], 0  ;;  %s828_s9 = smov 0   ;;  %s830_s10 = smov 0  }
   0xa   :  { %s832_s0 = smov 0   ;;  %s834_s11 = smov 0  }
   0xb   :  { %s836_s1 = smov 0   ;;  %s838_s12 = smov 0  }
   0xc LB: > { %s524_s13 = sadd.s32 4294967295, %s772_s12   ;;  %s525_s14 = sadd.s32 4294967294, %s772_s12   ;;  %s772_s12 = sphi %s838_s12, %s34_s12   ;;  %s768_s1 = sphi %s836_s1, %s994_s1   ;;  %s764_s11 = sphi %s834_s11, %s993_s11   ;;  %s760_s0 = sphi %s832_s0, %s992_s0   ;;  %s756_s10 = sphi %s830_s10, %s991_s10   ;;  %s752_s9 = sphi %s828_s9, %s990_s9  }
   0xd   : > { %s46_s15 = sadd.s32 1, %s768_s1  ;;  %s165_s16 = sadd.s32 1, %s760_s0 }
   0xe   : > { %p48_p0 = scmp.ge.s32.totalorder %s46_s15, 2  ;;  %p175_p1 = scmp.ne.s32.totalorder %s760_s0, %s756_s10 }
   0xf   : > { %p176_p2 = scmp.eq.s32.totalorder %s524_s13, 1  ;;  %p181_p3 = scmp.ne.s32.totalorder %s756_s10, %s752_s9 }
  0x10   : > { %s996_s15 = smov (%p48_p0, %s46_s15), 0  ;;  %p182_p5 = scmp.eq.s32.totalorder %s525_s14, 1 }
  0x11   : > { %p868_p4 = por %p176_p2, %p175_p1  ;;  %s162_s18 = ssub.s32 %s768_s1, %s996_s15 }
  0x12   : > { %p526_p6 = scmp.ge.s32.totalorder %s772_s12, 1  ;;  %p163_p7 = scmp.eq.s32.totalorder %s162_s18, 0 }
  0x13   : > { %p875_p8 = por %p182_p5, %p181_p3  ;;  %p189_p9 = scmp.lt.s32.totalorder %s772_s12, 3 }
  0x14   : > { %s881_s20 = scalar_select %p163_p7, %s760_s0, %s165_s16  }
  0x15   : > { %p190_p10 = pnand %p526_p6, %p189_p9  ;;  %p569_p11 = scmp.eq.s32.totalorder %s524_s13, 0 }
  0x16   : > { %s204_s23 = sshll.u32 %s982_s4, 4  ;;  %s776_s24 = smov [#allocation6]   ;;  %s205_s23 = int_to_ptr.hbm [resolvable:$true] %s204_s23 }
  0x17   : > { %p561_p12 = pneg %p190_p10  ;;  %s206_s25 = sshll.u32 %s776_s24, 4  ;;  %s207_s25 = int_to_ptr.vmem [resolvable:$true] %s206_s25 }
  0x18   : > { %236 = sbr.rel (%p190_p10) target bundleno = 629 (0x275), region = 40 }
  0x19   : > { %p562_p13 = pnand %p569_p11, %p561_p12 }
  0x1b   : > { %564 = dma.hbm_to_vmem [thread:$0]  (!%p562_p13), %s205_s23, 16, %s207_s25, [#allocation7]  }
  0x1d   : > { %743 = dma.done.wait (%p569_p11), [#allocation7], 16  }
  0x1e   : > { %745 = vsyncadd (%p569_p11), [#allocation7], 4294967280  ;;  %s263_s26 = sand.u32 1, %s756_s10   ;;  %v777_v0 = vmov -3.4028235e+38   ;;  %s890_s28 = sld [smem:[#allocation4 + %s764_s11]] }
  0x1f   : > { %s531_s27 = sshll.u32 %s263_s26, 3  ;;  %280 = vst [vmem:[#allocation2] sm:$0xff] %v777_v0  ;;  %s893_s29 = sld [smem:[#allocation5 + %s764_s11]]  ;;  %vm297_vm0 = vcmask 1043456   ;;  %v283_v1 = vld [vmem:[%s981_s3] sm:$0xf] }
  0x20   : > { %s895_s30 = scalar_lea.vmem [#allocation9], %s531_s27  ;;  %s532_s8 = sshll.u32 %s764_s11, 1  ;;  %v299_v2 = vsel %vm297_vm0, %v283_v1, 0  ;;  %vm293_vm1 = vcmask 64512   ;;  %v554_v7 = vld [vmem:[%s983_s5 + $0x8] sm:$0xff]  ;;  %v553_v8 = vld [vmem:[%s983_s5] sm:$0xff] }
  0x21   : > { %279 = vst [vmem:[%s895_s30] sm:$0xff] %v777_v0  ;;  %p268_p0 = scmp.lt.s32.totalorder %s532_s8, 3  ;;  %308 = vmatpush.bf16.msra.mxu0 %v299_v2  ;;  %346 = vmatpush.bf16.msra.mxu1 %v554_v7  ;;  %v628_v10 = vld [vmem:[#allocation6] ss:$0 sm:$0xff]  ;;  %vm336_vm2 = vcmask 261120   ;;  %v629_v17 = vld [vmem:[%s984_s6] ss:$0 sm:$0xff] }
  0x22   : > { %v630_v20 = vld [vmem:[%s984_s6 + $0x1] ss:$0 sm:$0xff]  ;;  %v631_v22 = vld [vmem:[%s984_s6 + $0x2] ss:$0 sm:$0xff] }
  0x23   : > { %s998_s8 = smov (!%p268_p0, %s532_s8), 3 }
  0x24   : > { %p369_p1 = scmp.le.s32.totalorder %s890_s28, 0  ;;  %s533_s16 = sshll.u32 %s998_s8, 2 }
  0x25   : > { %p370_p2 = scmp.ge.s32.totalorder %s893_s29, 0  ;;  %s271_s22 = scalar_lea.vmem %s980_s2, %s533_s16  ;;  %347 = vmatpush.bf16.msra.mxu1 %v553_v8 }
  0x26   : > { %v911_v3 = vld [vmem:[%s271_s22] sm:$0xff]  }
  0x27   : > { %p907_p3 = pnand %p370_p2, %p369_p1  ;;  %v552_v4 = vld [vmem:[%s271_s22] sm:$0xff]  ;;  %v364_v5 = vunpack.c.l.bf16 %v911_v3  ;;  %v365_v6 = vunpack.c.h.bf16 %v911_v3 }
  0x28   : > { %538 = vmatmul.msk.bf16.vlgmr.msra.gmra.mxu0 %vm293_vm1, %v552_v4 }
  0xa5   : > { %v310_v9 = vpop.f32.mrf.mxu0 }
  0xa6   : > { %v311_v11 = vadd.f32 %v628_v10, %v310_v9 }
  0xa8   : > { %v315_v14 = vmax.f32 %v311_v11, 0.0 }
  0xad   : > { %v312_v12 = vpop.f32.mrf.mxu0 }
  0xae   : > { %v313_v13 = vadd.f32 %v628_v10, %v312_v12 }
  0xb0   : > { %v316_v15 = vmax.f32 %v313_v13, 0.0 }
  0xb2   : > { %v317_v16 = vpack.c.bf16 %v316_v15, %v315_v14 }
  0xb4   : > { %547 = vmatmul.msk.bf16.vlgmr.msra.gmra.mxu1 %vm336_vm2, %v317_v16 }
 0x131   : > { %v349_v18 = vpop.f32.mrf.mxu1 }
 0x132   : > { %v350_v19 = vadd.f32 %v629_v17, %v349_v18 }
 0x134   : > { %v354_v21 = vmax.f32 %v350_v19, 0.0 }
 0x136   : > { %v358_v23 = vmul.f32 %v630_v20, %v354_v21 }
 0x138   : > { %v362_v24 = vadd.f32 %v631_v22, %v358_v23 }
 0x139   : > { %v351_v25 = vpop.f32.mrf.mxu1 }
 0x13a   : > { %v352_v26 = vadd.f32 %v629_v17, %v351_v25 }
 0x13c   : > { %v355_v27 = vmax.f32 %v352_v26, 0.0  ;;  %374 = sbr.rel (%p907_p3) target bundleno = 463 (0x1cf), region = 52 }
 0x13e   : > { %v359_v28 = vmul.f32 %v630_v20, %v355_v27 }
 0x140   : > { %v363_v29 = vadd.f32 %v631_v22, %v359_v28 }
 0x141   : > { %vm375_vm3 = vcmp.eq.f32.partialorder %v364_v5, 0.0  ;;  %v778_v30 = vmov 7   ;;  %v779_v31 = vmov 0   ;;  %vm376_vm4 = vcmp.eq.f32.partialorder %v365_v6, 0.0 }
 0x142   : > { %632 = vset.pattern.permute.xlu0 %v778_v30  ;;  %v377_v32 = vsel %vm375_vm3, 1, %v779_v31  ;;  %v378_v33 = vsel %vm376_vm4, 1, %v779_v31 }
 0x143   : > { %380 = vperm.xlu0 %632, %v377_v32  }
 0x14b   : > { %383 = vperm.xlu0 %632, %v378_v33  }
 0x1b5   : > { %v381_v34 = vpop.permute.xlu0 %380 }
 0x1b6   : > { %vm385_vm5 = vcmp.eq.s32.totalorder %v381_v34, 1 }
 0x1b7   : > { %v387_v36 = vsel %vm385_vm5, %v362_v24, -3.4028235e+38 }
 0x1bd   : > { %v384_v35 = vpop.permute.xlu0 %383 }
 0x1be   : > { %vm386_vm6 = vcmp.eq.s32.totalorder %v384_v35, 1 }
 0x1bf   : > { %v388_v37 = vsel %vm386_vm6, %v363_v29, -3.4028235e+38 }
 0x1c0   : > { %v389_v38 = vmax.f32 %v387_v36, %v388_v37 }
 0x1c2   : > { %v390_v39 = vrot.slane %v389_v38, 4 }
 0x1c4   : > { %v391_v40 = vmax.f32 %v389_v38, %v390_v39 }
 0x1c6   : > { %v392_v41 = vrot.slane %v391_v40, 2 }
 0x1c8   : > { %v393_v42 = vmax.f32 %v391_v40, %v392_v41 }
 0x1ca   : > { %v394_v43 = vrot.slane %v393_v42, 1 }
 0x1cc   : > { %v395_v44 = vmax.f32 %v393_v42, %v394_v43 }
 0x1ce   : > { %396 = vst [vmem:[#allocation2] sm:$0x1] %v395_v44 }
 0x1cf PF: > { %p397_p5 = scmp.le.s32.totalorder %s890_s28, 1  ;;  %p398_p6 = scmp.ge.s32.totalorder %s893_s29, 1 }
 0x1d1   : > { %p399_p7 = pnand %p398_p6, %p397_p5 }
 0x1d3   : > { %402 = sbr.rel (%p399_p7) target bundleno = 614 (0x266), region = 56 }
 0x1d8   : > { %vm403_vm7 = vcmp.eq.f32.partialorder %v364_v5, 1.0  ;;  %v780_v45 = vmov 7   ;;  %v781_v46 = vmov 0   ;;  %vm404_vm8 = vcmp.eq.f32.partialorder %v365_v6, 1.0 }
 0x1d9   : > { %633 = vset.pattern.permute.xlu0 %v780_v45  ;;  %v405_v47 = vsel %vm403_vm7, 1, %v781_v46  ;;  %v406_v48 = vsel %vm404_vm8, 1, %v781_v46 }
 0x1da   : > { %408 = vperm.xlu0 %633, %v405_v47  }
 0x1e2   : > { %411 = vperm.xlu0 %633, %v406_v48  }
 0x24c   : > { %v409_v49 = vpop.permute.xlu0 %408 }
 0x24d   : > { %vm413_vm9 = vcmp.eq.s32.totalorder %v409_v49, 1 }
 0x24e   : > { %v415_v51 = vsel %vm413_vm9, %v362_v24, -3.4028235e+38 }
 0x254   : > { %v412_v50 = vpop.permute.xlu0 %411 }
 0x255   : > { %vm414_vm10 = vcmp.eq.s32.totalorder %v412_v50, 1 }
 0x256   : > { %v416_v52 = vsel %vm414_vm10, %v363_v29, -3.4028235e+38 }
 0x257   : > { %v417_v53 = vmax.f32 %v415_v51, %v416_v52 }
 0x259   : > { %v418_v54 = vrot.slane %v417_v53, 4 }
 0x25b   : > { %v419_v55 = vmax.f32 %v417_v53, %v418_v54 }
 0x25d   : > { %v420_v56 = vrot.slane %v419_v55, 2 }
 0x25f   : > { %v421_v57 = vmax.f32 %v419_v55, %v420_v56 }
 0x261   : > { %v422_v58 = vrot.slane %v421_v57, 1 }
 0x263   : > { %v423_v59 = vmax.f32 %v421_v57, %v422_v58 }
 0x265   : > { %424 = vst [vmem:[#allocation2 + $0x1] sm:$0x1] %v423_v59 }
 0x266 PF: > { %v425_v60 = vld [vmem:[%s895_s30] sm:$0xff]  ;;  %s549_s28 = sshll.u32 %s764_s11, 3  ;;  %s442_s25 = sshll.u32 %s895_s30, 4  ;;  %s443_s25 = int_to_ptr.vmem [resolvable:$true] %s442_s25 }
 0x267   : > { %s440_s24 = scalar_lea.hbm %s985_s7, %s549_s28  ;;  %s430_s8 = scalar_lea.sflag [#allocation8], %s263_s26 }
 0x268   : > { %s444_s27 = sshll.u32 %s440_s24, 4  ;;  %s708_s18 = scalar_lea.hbm %s985_s7, 16  ;;  %s445_s27 = int_to_ptr.hbm [resolvable:$true] %s444_s27 }
 0x269   : > { %s702_s13 = sshra.s32 %s445_s27, 4  ;;  %s703_s13 = int_to_ptr.hbm [resolvable:$true] %s702_s13 }
 0x26a   : > { %s704_s14 = scalar_lea.hbm %s703_s13, 8  ;;  %p709_p12 = scmp.lt.s32.totalorder %s703_s13, %s985_s7 }
 0x26b   : > { %p705_p9 = scmp.ne.s32.totalorder %s703_s13, %s704_s14  ;;  %p710_p13 = scmp.lt.s32.totalorder %s708_s18, %s704_s14 }
 0x26c   : > { %v426_v61 = vld [vmem:[#allocation2] sm:$0xff] }
 0x26d   : > { %v427_v62 = vmax.f32 %v425_v60, %v426_v61  ;;  %p706_p10 = pnand %p705_p9, %p868_p4  ;;  %p711_p0 = por %p710_p13, %p709_p12 }
 0x26f   : > { %428 = vst [vmem:[%s895_s30] sm:$0xff] %v427_v62  ;;  %p707_p11 = pneg %p706_p10 }
 0x271   : > { %p712_p1 = pnand %p711_p0, %p707_p11 }
 0x273   : > { %715 = shalt.err (!%p712_p1)
}
 0x274   : > { %559 = dma.vmem_to_hbm [thread:$0]  (%p868_p4), %s443_s25, 128, %s445_s27, %s430_s8  }
 0x275 PF: > { %p571_p2 = scmp.ge.s32.totalorder %s772_s12, 2  ;;  %s456_s26 = sand.u32 1, %s752_s9  }
 0x276   : > { %s457_s30 = scalar_lea.sflag [#allocation8], %s456_s26 }
 0x277   : > { %p566_p3 = pnand %p571_p2, %p875_p8 }
 0x279   : > { %p567_p5 = pneg %p566_p3 }
 0x27b   : > { %747 = dma.done.wait (%p567_p5), %s457_s30, 128  }
 0x27c   : > { %749 = vsyncadd (%p567_p5), %s457_s30, 4294967168  ;;  %s34_s12 = sadd.s32 1, %s772_s12   ;;  %s990_s9 = smov %s756_s10 }
 0x27d   : > { %p31_p6 = scmp.ge.s32.totalorder %s34_s12, 4   ;;  %s991_s10 = smov %s760_s0 }
 0x27e   : > { %s992_s0 = smov %s881_s20  ;;  %s993_s11 = smov %s768_s1 }
 0x27f   : > { %s994_s1 = smov %s996_s15  ;;  %33 = sbr.rel (!%p31_p6) target bundleno = 12 (0xc), region = 92 }
 0x284   :  { %463 = vsyncpa [#allocation7], 1 }
 0x285   :  { %465 = vsyncpa [#allocation7 + $0x1], 1 }
 0x286   :  { %466 = vsyncpa [#allocation8], 1 }
 0x287   :  { %468 = vsyncpa [#allocation8 + $0x1], 1 }

</bundles_post_ra>
